<compile_context>
chip_gen: v5e
topology: v5e:2x2
jax: 0.10.0
libtpu: 0.0.40
codegen_flags: <defaults>
</compile_context>

<pallas_src>
import jax
import jax.numpy as jnp
from jax.experimental import pallas as pl
from jax.experimental.pallas import tpu as pltpu

_LANE = 128
_SUBLANE = 8
_MAX_BLOCK_BATCH = 512  # rows per grid step; >=512 lands ~85% of HBM roofline


def _round_up(x, m):
    return (x + m - 1) // m * m


def _linear_head_kernel(x_ref, w_ref, b_ref, o_ref):
    # x_ref: (TB, D)  w_ref: (D, Cp)  b_ref: (1, Cp)  o_ref: (TB, Cp)
    logits = jnp.dot(x_ref[...], w_ref[...], preferred_element_type=jnp.float32)
    o_ref[...] = (logits + b_ref[...]).astype(o_ref.dtype)


def binary_classifier_forward(x, weight, bias, *, block_batch=_MAX_BLOCK_BATCH):
    """logits = x @ weight + bias as a batch-tiled, pipelined Pallas kernel.

    x:      (batch, input_dim) float32
    weight: (input_dim, output_dim) float32
    bias:   (output_dim,) float32
    returns (batch, output_dim) float32
    """
    batch, input_dim = x.shape
    input_dim_w, output_dim = weight.shape
    assert input_dim == input_dim_w
    assert bias.shape == (output_dim,)

    # Lane-dense output: pad classifier columns to a full 128-lane width so the
    # store path uses unmasked vst and the MXU result columns aren't 2/128.
    c_pad = _round_up(output_dim, _LANE)
    w_pad = jnp.zeros((input_dim, c_pad), weight.dtype).at[:, :output_dim].set(weight)
    b_pad = jnp.zeros((1, c_pad), bias.dtype).at[0, :output_dim].set(bias)

    # Batch tile: multiple of 8 sublanes, big enough to amortize ~0.35us/step,
    # capped so double-buffered x tiles stay well inside v7x's 64 MiB VMEM.
    tb = min(_round_up(batch, _SUBLANE), _round_up(block_batch, _SUBLANE))
    padded_batch = _round_up(batch, tb)
    if padded_batch != batch:
        x = jnp.zeros((padded_batch, input_dim), x.dtype).at[:batch].set(x)

    grid = (padded_batch // tb,)

    cost = pl.CostEstimate(
        flops=2 * padded_batch * input_dim * c_pad,
        transcendentals=0,
        bytes_accessed=(x.dtype.itemsize * padded_batch * input_dim
                        + w_pad.dtype.itemsize * input_dim * c_pad
                        + 4 * padded_batch * c_pad),
    )

    out = pl.pallas_call(
        _linear_head_kernel,
        out_shape=jax.ShapeDtypeStruct((padded_batch, c_pad), jnp.float32),
        grid=grid,
        in_specs=[
            pl.BlockSpec((tb, input_dim), lambda i: (i, 0)),       # x: streamed per tile
            pl.BlockSpec((input_dim, c_pad), lambda i: (0, 0)),    # W: resident
            pl.BlockSpec((1, c_pad), lambda i: (0, 0)),            # b: resident
        ],
        out_specs=pl.BlockSpec((tb, c_pad), lambda i: (i, 0)),
        compiler_params=pltpu.CompilerParams(
            dimension_semantics=("parallel",),        # shard batch tiles across TCs on v7x
            vmem_limit_bytes=64 * 1024 * 1024,
        ),
        cost_estimate=cost,
    )(x, w_pad, b_pad)

    # Drop row padding and the lane-padding columns.
    return out[:batch, :output_dim]


if __name__ == "__main__":
    # Small shapes consistent with the module (default output_dim=2).
    # batch=10 deliberately exercises the ragged-batch padding path.
    batch, input_dim, output_dim = 10, 32, 2

    key = jax.random.PRNGKey(0)
    kx, kw, kb = jax.random.split(key, 3)

    x = jax.random.normal(kx, (batch, input_dim), dtype=jnp.float32)
    weight = jax.random.normal(kw, (input_dim, output_dim), dtype=jnp.float32) * 0.02
    bias = jax.random.normal(kb, (output_dim,), dtype=jnp.float32) * 0.02

    logits = binary_classifier_forward(x, weight, bias)
    jax.block_until_ready(logits)

    # Reference check against plain JAX.
    ref = x @ weight + bias[None, :]
    assert logits.shape == (batch, output_dim)
    assert jnp.allclose(logits, ref, atol=1e-5, rtol=1e-5)

    print("KERNEL_OK")
</pallas_src>

<mosaic_0001>
module attributes {stable_mosaic.version = 11 : i64} {
  func.func @_linear_head_kernel(%arg0: i32, %arg1: memref<16x32xf32, #tpu.memory_space<vmem>>, %arg2: memref<32x128xf32, #tpu.memory_space<vmem>>, %arg3: memref<1x128xf32, #tpu.memory_space<vmem>>, %arg4: memref<16x128xf32, #tpu.memory_space<vmem>>) attributes {dimension_semantics = [#tpu.dimension_semantics<parallel>], iteration_bounds = array<i64: 1>, scalar_prefetch = 0 : i64, scratch_operands = 0 : i64, tpu.core_type = #tpu.core_type<tc>, window_params = [{transform_indices = @transform_0, window_bounds = array<i64: 16, 32>}, {pipeline_mode = #tpu.pipeline_mode<synchronous>, transform_indices = @transform_1, window_bounds = array<i64: 32, 128>}, {pipeline_mode = #tpu.pipeline_mode<synchronous>, transform_indices = @transform_2, window_bounds = array<i64: 1, 128>}, {transform_indices = @transform_3, window_bounds = array<i64: 16, 128>}]} {
    %c0 = arith.constant 0 : index
    %c0_0 = arith.constant 0 : index
    %0 = vector.load %arg1[%c0, %c0_0] : memref<16x32xf32, #tpu.memory_space<vmem>>, vector<16x32xf32>
    %c0_1 = arith.constant 0 : index
    %c0_2 = arith.constant 0 : index
    %1 = vector.load %arg2[%c0_1, %c0_2] : memref<32x128xf32, #tpu.memory_space<vmem>>, vector<32x128xf32>
    %cst = arith.constant dense<0.000000e+00> : vector<16x128xf32>
    %2 = tpu.matmul %0, %1, %cst {dimension_numbers = #tpu.dot_dimension_numbers<[1], [0], [0], [1], [0, 0, 1, 1], [], []>} : vector<16x32xf32>, vector<32x128xf32>, vector<16x128xf32> -> vector<16x128xf32>
    %c0_3 = arith.constant 0 : index
    %c0_4 = arith.constant 0 : index
    %3 = vector.load %arg3[%c0_3, %c0_4] : memref<1x128xf32, #tpu.memory_space<vmem>>, vector<1x128xf32>
    %4 = vector.broadcast %3 : vector<1x128xf32> to vector<16x128xf32>
    %5 = arith.addf %2, %4 : vector<16x128xf32>
    %c0_5 = arith.constant 0 : index
    %c0_6 = arith.constant 0 : index
    %6 = vector.load %arg4[%c0_5, %c0_6] : memref<16x128xf32, #tpu.memory_space<vmem>>, vector<16x128xf32>
    tpu.vector_store %arg4[%c0_5, %c0_6], %5 {strides = array<i32>} : memref<16x128xf32, #tpu.memory_space<vmem>>, vector<16x128xf32>,
    return
  }
  func.func @transform_0(%arg0: i32) -> (i32, i32) {
    %c0_i32 = arith.constant 0 : i32
    %c0_i32_0 = arith.constant 0 : i32
    return %arg0, %c0_i32 : i32, i32
  }
  func.func @transform_1(%arg0: i32) -> (i32, i32) {
    %c0_i32 = arith.constant 0 : i32
    %c0_i32_0 = arith.constant 0 : i32
    %c0_i32_1 = arith.constant 0 : i32
    return %c0_i32, %c0_i32_0 : i32, i32
  }
  func.func @transform_2(%arg0: i32) -> (i32, i32) {
    %c0_i32 = arith.constant 0 : i32
    %c0_i32_0 = arith.constant 0 : i32
    %c0_i32_1 = arith.constant 0 : i32
    return %c0_i32, %c0_i32_0 : i32, i32
  }
  func.func @transform_3(%arg0: i32) -> (i32, i32) {
    %c0_i32 = arith.constant 0 : i32
    %c0_i32_0 = arith.constant 0 : i32
    return %arg0, %c0_i32 : i32, i32
  }
}

</mosaic_0001>

<bundles_post_ra>
// kernel: tpu_custom_call.1
= control target key start
LH: loop header
LB: loop body
LE: loop exit
PB: predicated region body
PF: predicated region fallthrough
CT: control target
= control target key end

     0   :  { %8 = vsyncpa [#allocation3], 0  ;;  %s245_s0 = inlined_call_operand.hbm [shape: f32[16,32], index: 0, kind: input, shape index: {}]   ;;  %s246_s1 = inlined_call_operand.hbm [shape: f32[32,128], index: 1, kind: input, shape index: {}]   ;;  %s247_s2 = inlined_call_operand.vmem [shape: f32[1,128], index: 2, kind: input, shape index: {}]   ;;  %s248_s3 = inlined_call_operand.hbm [shape: f32[16,128], index: 3, kind: output, shape index: {}]  }
   0x1   :  { %9 = vsyncpa [#allocation6], 0 }
   0x2   :  { %10 = vsyncpa [#allocation4], 0  ;;  %s15_s14 = sshll.u32 %s245_s0, 4  ;;  %s199_s15 = smov [#allocation2]   ;;  %s16_s14 = int_to_ptr.hbm [resolvable:$true] %s15_s14 }
   0x3   :  { %s17_s16 = sshll.u32 %s199_s15, 4  ;;  %s28_s19 = sshll.u32 %s246_s1, 4  ;;  %s18_s16 = int_to_ptr.vmem [resolvable:$true] %s17_s16  ;;  %s29_s19 = int_to_ptr.hbm [resolvable:$true] %s28_s19 }
   0x4   :  { %s200_s20 = smov 128   ;;  %s201_s21 = smov 8  }
   0x5   :  { %23 = dma.hbm_to_vmem [thread:$0]  %s16_s14, 256, %s18_s16, [#allocation3], %s200_s20, %s200_s20, %s201_s21  }
   0x6   :  { %s202_s22 = smov [#allocation5]  }
   0x7   :  { %s30_s23 = sshll.u32 %s202_s22, 4  ;;  %s31_s23 = int_to_ptr.vmem [resolvable:$true] %s30_s23 }
   0x8   :  { %36 = dma.hbm_to_vmem [thread:$0]  %s29_s19, 512, %s31_s23, [#allocation6], %s200_s20, %s200_s20, %s201_s21  }
   0x9   :  { %193 = dma.done.wait [#allocation3], 256  }
   0xa   :  { %194 = vsyncadd [#allocation3], 4294967040 }
   0xb   :  { %195 = dma.done.wait [#allocation6], 512  }
   0xc   :  { %196 = vsyncadd [#allocation6], 4294966784  ;;  %v52_v0 = vld [vmem:[#allocation5 + $0x18] sm:$0xff]  ;;  %v51_v1 = vld [vmem:[#allocation5 + $0x10] sm:$0xff]  ;;  %vm57_vm0 = vcmask 261120   ;;  %s203_s24 = smov [#allocation7]  }
   0xd   :  { %76 = vmatpush.msra.mxu0 %v52_v0  ;;  %111 = vmatpush.msra.mxu1 %v52_v0  ;;  %v50_v2 = vld [vmem:[#allocation5 + $0x8] sm:$0xff]  ;;  %v49_v3 = vld [vmem:[#allocation5] sm:$0xff]  ;;  %v47_v4 = vld [vmem:[#allocation2] sm:$0xff]  ;;  %s93_s25 = sshll.u32 %s203_s24, 4  ;;  %s95_s28 = sshll.u32 %s248_s3, 4  ;;  %s94_s25 = int_to_ptr.vmem [resolvable:$true] %s93_s25  ;;  %s96_s28 = int_to_ptr.hbm [resolvable:$true] %s95_s28 }
   0xe   :  { %v48_v5 = vld [vmem:[#allocation2 + $0x8] sm:$0xff]  ;;  %v120_v6 = vld [vmem:[%s247_s2] ss:$0 sm:$0xff] }
   0xf   :  { %77 = vmatpush.msra.mxu0 %v51_v1  ;;  %112 = vmatpush.msra.mxu1 %v51_v1 }
  0x11   :  { %78 = vmatpush.msra.mxu0 %v50_v2  ;;  %113 = vmatpush.msra.mxu1 %v50_v2 }
  0x13   :  { %79 = vmatpush.msra.mxu0 %v49_v3  ;;  %114 = vmatpush.msra.mxu1 %v49_v3 }
  0x14   :  { %109 = vmatmul.msk.f32.vlgmr.msra.gmra.mxu0 %vm57_vm0, %v47_v4  ;;  %110 = vmatmul.msk.f32.vlgmr.msra.gmra.mxu1 %vm57_vm0, %v48_v5 }
  0x91   :  { %v81_v7 = vpop.f32.mrf.mxu0  ;;  %v84_v8 = vpop.f32.mrf.mxu1 }
  0x92   :  { %v82_v9 = vadd.f32 %v120_v6, %v81_v7  ;;  %v85_v10 = vadd.f32 %v120_v6, %v84_v8 }
  0x94   :  { %87 = vst [vmem:[#allocation7] sm:$0xff] %v82_v9 }
  0x95   :  { %88 = vst [vmem:[#allocation7 + $0x8] sm:$0xff] %v85_v10 }
  0x96   :  { %101 = dma.vmem_to_hbm [thread:$0]  %s94_s25, 256, %s96_s28, [#allocation4], %s200_s20, %s200_s20, %s201_s21  }
  0x97   :  { %197 = dma.done.wait [#allocation4], 256  }
  0x98   :  { %198 = vsyncadd [#allocation4], 4294967040 }
  0x99   :  { %106 = vsyncpa [#allocation3], 1 }
  0x9a   :  { %107 = vsyncpa [#allocation6], 1 }
  0x9b   :  { %108 = vsyncpa [#allocation4], 1 }

</bundles_post_ra>
